<compile_context>
chip_gen: v7x
topology: tpu7x:2x2x1
jax: 0.10.0
libtpu: 0.0.40
codegen_flags: <defaults>
</compile_context>

<pallas_src>
import jax
import jax.numpy as jnp
from jax.experimental import pallas as pl
from jax.experimental.pallas import tpu as pltpu


def _masked_l1_num_kernel(x_ref, y_ref, m_ref, num_ref):
    # x_ref, y_ref: (b_tile, c_tile, hw_tile) VMEM; m_ref: (b_tile, 1, hw_tile) VMEM
    # (broadcast over channels). num_ref: (1, 1) SMEM scalar output for this grid step.
    x = x_ref[...].astype(jnp.float32)
    y = y_ref[...].astype(jnp.float32)
    m = m_ref[...].astype(jnp.float32)
    # |(x - y) * m| == |x*m - y*m| (up to fp rounding) for masks of any sign,
    # and uses one fewer multiply per element.
    num_ref[0, 0] = jnp.sum(jnp.abs((x - y) * m))


def _vmem_budget_bytes():
    """~3/4 of physical VMEM (capped at 96 MiB), conservative 48 MiB fallback."""
    cap = 64 << 20
    try:
        info = pltpu.get_tpu_info()
        cap = int(getattr(info, "vmem_capacity_bytes", cap)) or cap
    except Exception:
        pass
    return max(32 << 20, min(cap * 3 // 4, 96 << 20))


def _divisor_tiles(n, multiple):
    """Divisors of n that are positive multiples of `multiple`, plus n itself."""
    cands = {n}
    d = multiple
    while d < n:
        if n % d == 0:
            cands.add(d)
        d += multiple
    return sorted(cands)


def _pick_tiles(B, C, HW, itemsize, mask_itemsize, target_bytes):
    """Pick (b_tile, c_tile, hw_tile) obeying the (8,128) rule and the byte target.

    c_tile: divisor of C and multiple of the packed-sublane count (or == C).
    hw_tile: divisor of HW and multiple of 128 (or == HW).
    """
    # Whole problem fits comfortably -> single grid step with B folded into the block.
    whole = 2 * B * C * HW * itemsize + B * HW * mask_itemsize
    if whole <= target_bytes:
        return B, C, HW

    sub = max(8, 32 // itemsize)           # packed sublanes: 8 f32, 16 bf16, 32 int8/fp8
    c_cands = _divisor_tiles(C, sub)       # includes C itself (valid even if C < sub, e.g. C=3)
    hw_cands = _divisor_tiles(HW, 128)     # includes HW itself

    fitting = [(ct * ht, ct, ht)
               for ct in c_cands for ht in hw_cands
               if ct * ht * itemsize <= target_bytes]
    if fitting:
        _, ct, ht = max(fitting)           # fattest tile under the target
    else:
        # Pathological shapes (e.g. C not splittable AND HW with no 128-multiple divisor):
        # take the smallest legal block and rely on vmem_limit_bytes headroom.
        _, ct, ht = min((ct * ht, ct, ht) for ct in c_cands for ht in hw_cands)
    return 1, ct, ht


def complete_frames_recon_loss(outputs, targets, masks, target_tile_bytes=None):
    """outputs, targets: (B, C, H, W); masks: (B, 1, H, W). Returns scalar f32 loss."""
    B, C, H, W = outputs.shape
    assert targets.shape == (B, C, H, W)
    assert masks.shape == (B, 1, H, W)

    HW = H * W
    itemsize = jnp.dtype(outputs.dtype).itemsize
    m_itemsize = jnp.dtype(masks.dtype).itemsize

    vmem_budget = _vmem_budget_bytes()
    if target_tile_bytes is None:
        # 2 inputs x 2 pipeline buffers x tile = 2/3 of budget; rest for mask buffers/misc.
        target_tile_bytes = vmem_budget // 6

    b_tile, c_tile, hw_tile = _pick_tiles(B, C, HW, itemsize, m_itemsize, target_tile_bytes)
    n_b = B // b_tile
    n_hw = HW // hw_tile
    n_ct = C // c_tile

    # Free metadata reshape to a lane-dense (..., H*W) layout.
    x2 = outputs.reshape(B, C, HW)
    y2 = targets.reshape(B, C, HW)
    mk = masks.reshape(B, 1, HW)

    # Grid: (batch, hw-tile, channel-tile); channel innermost -> mask DMA skipped across c.
    xy_spec = pl.BlockSpec((b_tile, c_tile, hw_tile), lambda b, h, c: (b, c, h))
    m_spec = pl.BlockSpec((b_tile, 1, hw_tile), lambda b, h, c: (b, 0, h))
    num_spec = pl.BlockSpec((1, 1), lambda b, h, c: (b * n_hw + h, c),
                            memory_space=pltpu.SMEM)

    bytes_accessed = int(
        outputs.size * itemsize
        + targets.size * jnp.dtype(targets.dtype).itemsize
        + masks.size * m_itemsize
        + n_b * n_hw * n_ct * 4
    )
    cost = pl.CostEstimate(
        flops=int(4 * B * C * HW),  # sub + mul + abs + reduce-add per element
        transcendentals=0,
        bytes_accessed=bytes_accessed,
    )

    num = pl.pallas_call(
        _masked_l1_num_kernel,
        out_shape=jax.ShapeDtypeStruct((n_b * n_hw, n_ct), jnp.float32),
        grid_spec=pl.GridSpec(
            grid=(n_b, n_hw, n_ct),
            in_specs=[xy_spec, xy_spec, m_spec],
            out_specs=num_spec,
        ),
        compiler_params=pltpu.CompilerParams(
            # Every output block is written exactly once -> all axes may be parallel
            # (v7x megacore can shard batch, HW or channel work).
            dimension_semantics=("parallel", "parallel", "parallel"),
            vmem_limit_bytes=int(vmem_budget),
        ),
        cost_estimate=cost,
    )(x2, y2, mk)

    # Denominator over the (small) mask array in plain JAX; tiny final reduce + divide.
    # Matches the PyTorch reference exactly, including NaN/Inf when sum(masks) == 0.
    den = jnp.sum(masks.astype(jnp.float32))
    return (jnp.sum(num) / den).astype(jnp.float32)


def _reference(outputs, targets, masks):
    num = jnp.sum(jnp.abs(outputs * masks - targets * masks))
    den = jnp.sum(masks)
    return num / den


if __name__ == "__main__":
    key = jax.random.PRNGKey(0)
    k1, k2, k3, k4, k5, k6 = jax.random.split(key, 6)

    # --- Test 1: module-spec shape, binary masks (tiny -> single-step grid, B folded). ---
    B, C, H, W = 2, 4, 16, 16
    outputs = jax.random.normal(k1, (B, C, H, W), dtype=jnp.float32)
    targets = jax.random.normal(k2, (B, C, H, W), dtype=jnp.float32)
    masks = (jax.random.uniform(k3, (B, 1, H, W)) > 0.5).astype(jnp.float32)

    loss = jax.block_until_ready(complete_frames_recon_loss(outputs, targets, masks))
    ref = _reference(outputs, targets, masks)
    assert jnp.allclose(loss, ref, rtol=1e-5, atol=1e-5), (loss, ref)

    # --- Test 2: forced small tile target -> exercises (B, HW, C) tiling, mask reuse
    #     across channel steps, and non-binary (even negative) masks. ---
    B2, C2, H2, W2 = 2, 16, 16, 16
    o2 = jax.random.normal(k4, (B2, C2, H2, W2), dtype=jnp.float32)
    t2 = jax.random.normal(k5, (B2, C2, H2, W2), dtype=jnp.float32)
    m2 = jax.random.uniform(k6, (B2, 1, H2, W2), dtype=jnp.float32,
                            minval=-0.5, maxval=1.0)

    loss2 = jax.block_until_ready(
        complete_frames_recon_loss(o2, t2, m2, target_tile_bytes=4 * 1024))
    ref2 = _reference(o2, t2, m2)
    assert jnp.allclose(loss2, ref2, rtol=1e-5, atol=1e-5), (loss2, ref2)

    print("KERNEL_OK")
</pallas_src>

<mosaic_0001>
module attributes {stable_mosaic.version = 11 : i64} {
  func.func @_masked_l1_num_kernel(%arg0: i32, %arg1: i32, %arg2: i32, %arg3: memref<2x4x256xf32, #tpu.memory_space<vmem>>, %arg4: memref<2x4x256xf32, #tpu.memory_space<vmem>>, %arg5: memref<2x1x256xf32, #tpu.memory_space<vmem>>, %arg6: memref<1x1xf32, #tpu.memory_space<smem>>) attributes {dimension_semantics = [#tpu.dimension_semantics<parallel>, #tpu.dimension_semantics<parallel>, #tpu.dimension_semantics<parallel>], iteration_bounds = array<i64: 1, 1, 1>, scalar_prefetch = 0 : i64, scratch_operands = 0 : i64, tpu.core_type = #tpu.core_type<tc>, window_params = [{transform_indices = @transform_0, window_bounds = array<i64: 2, 4, 256>}, {transform_indices = @transform_1, window_bounds = array<i64: 2, 4, 256>}, {transform_indices = @transform_2, window_bounds = array<i64: 2, 1, 256>}, {transform_indices = @transform_3, window_bounds = array<i64: 1, 1>}]} {
    %c0 = arith.constant 0 : index
    %c0_0 = arith.constant 0 : index
    %c0_1 = arith.constant 0 : index
    %0 = vector.load %arg3[%c0, %c0_0, %c0_1] : memref<2x4x256xf32, #tpu.memory_space<vmem>>, vector<2x4x256xf32>
    %c0_2 = arith.constant 0 : index
    %c0_3 = arith.constant 0 : index
    %c0_4 = arith.constant 0 : index
    %1 = vector.load %arg4[%c0_2, %c0_3, %c0_4] : memref<2x4x256xf32, #tpu.memory_space<vmem>>, vector<2x4x256xf32>
    %c0_5 = arith.constant 0 : index
    %c0_6 = arith.constant 0 : index
    %c0_7 = arith.constant 0 : index
    %2 = vector.load %arg5[%c0_5, %c0_6, %c0_7] : memref<2x1x256xf32, #tpu.memory_space<vmem>>, vector<2x1x256xf32>
    %3 = arith.subf %0, %1 : vector<2x4x256xf32>
    %4 = vector.broadcast %2 : vector<2x1x256xf32> to vector<2x4x256xf32>
    %5 = arith.mulf %3, %4 : vector<2x4x256xf32>
    %6 = math.absf %5 : vector<2x4x256xf32>
    %7 = vector.shape_cast %6 : vector<2x4x256xf32> to vector<1x2x4x256xf32>
    %cst = arith.constant dense<0.000000e+00> : vector<1xf32>
    %8 = vector.multi_reduction <add>, %7, %cst [1, 2, 3] : vector<1x2x4x256xf32> to vector<1xf32>
    %9 = vector.shape_cast %8 : vector<1xf32> to vector<1x1x1x1xf32>
    %10 = vector.extract %9[0, 0, 0, 0] : f32 from vector<1x1x1x1xf32>
    %c0_8 = arith.constant 0 : index
    %c0_9 = arith.constant 0 : index
    %11 = memref.load %arg6[%c0_8, %c0_9] : memref<1x1xf32, #tpu.memory_space<smem>>
    memref.store %10, %arg6[%c0_8, %c0_9] : memref<1x1xf32, #tpu.memory_space<smem>>
    return
  }
  func.func @transform_0(%arg0: i32, %arg1: i32, %arg2: i32) -> (i32, i32, i32) {
    %c0_i32 = arith.constant 0 : i32
    return %arg0, %arg2, %arg1 : i32, i32, i32
  }
  func.func @transform_1(%arg0: i32, %arg1: i32, %arg2: i32) -> (i32, i32, i32) {
    %c0_i32 = arith.constant 0 : i32
    return %arg0, %arg2, %arg1 : i32, i32, i32
  }
  func.func @transform_2(%arg0: i32, %arg1: i32, %arg2: i32) -> (i32, i32, i32) {
    %c0_i32 = arith.constant 0 : i32
    %c0_i32_0 = arith.constant 0 : i32
    return %arg0, %c0_i32, %arg1 : i32, i32, i32
  }
  func.func @transform_3(%arg0: i32, %arg1: i32, %arg2: i32) -> (i32, i32) {
    %c1_i32 = arith.constant 1 : i32
    %0 = arith.muli %arg0, %c1_i32 : i32
    %1 = arith.addi %0, %arg1 : i32
    %c0_i32 = arith.constant 0 : i32
    return %1, %arg2 : i32, i32
  }
}

</mosaic_0001>

<bundles_post_ra>
// kernel: tpu_custom_call.1
= control target key start
LH: loop header
LB: loop body
LE: loop exit
PB: predicated region body
PF: predicated region fallthrough
CT: control target
= control target key end

     0   :  { %8 = vsyncpa [#allocation3], 0  ;;  %s255_s0 = inlined_call_operand.hbm [shape: f32[2,4,256], index: 0, kind: input, shape index: {}]   ;;  %s256_s1 = inlined_call_operand.hbm [shape: f32[2,4,256], index: 1, kind: input, shape index: {}]   ;;  %s257_s2 = inlined_call_operand.vmem [shape: f32[2,1,256], index: 2, kind: input, shape index: {}]   ;;  %s258_s3 = inlined_call_operand.hbm [shape: f32[1,1], index: 3, kind: output, shape index: {}]  }
   0x1   :  { %9 = vsyncpa [#allocation6], 0 }
   0x2   :  { %10 = vsyncpa [#allocation4], 0  ;;  %s188_s12 = smov [#allocation2]   ;;  %s128_s16 = scalar_lea.hbm %s255_s0, 256 }
   0x3   :  { %s16_s13 = sshll.u32 %s188_s12, 4  ;;  %p129_p0 = scmp.ne.s32.totalorder %s255_s0, %s128_s16  ;;  %s17_s13 = int_to_ptr.vmem [resolvable:$true] %s16_s13 }
   0x4   :  { %p132_p1 = scmp.lt.u32.totalorder %s128_s16, %s255_s0 }
   0x6   :  { %p134_p2 = pnand %p132_p1, %p129_p0 }
   0x8   :  { %137 = shalt.err (!%p134_p2)
}
   0x9   :  { %s138_s21 = scalar_lea.vmem %s17_s13, 256  ;;  %p143_p4 = scmp.lt.s32.totalorder %s17_s13, %s17_s13 }
   0xa   :  { %p139_p3 = scmp.ne.s32.totalorder %s17_s13, %s138_s21  ;;  %p144_p5 = scmp.lt.s32.totalorder %s138_s21, %s138_s21 }
   0xc   :  { %p145_p6 = por %p144_p5, %p143_p4 }
   0xe   :  { %p146_p7 = pnand %p145_p6, %p139_p3 }
  0x10   :  { %149 = shalt.err (!%p146_p7)
}
  0x11   :  { %s189_s22 = smov 128   ;;  %s190_s23 = smov 8  }
  0x12   :  { %22 = dma.hbm_to_vmem [thread:$0]  %s255_s0, 256, %s17_s13, [#allocation3], %s189_s22, %s189_s22, %s190_s23  }
  0x13   :  { %s191_s26 = smov [#allocation5]   ;;  %s150_s30 = scalar_lea.hbm %s256_s1, 256 }
  0x14   :  { %s28_s27 = sshll.u32 %s191_s26, 4  ;;  %p151_p8 = scmp.ne.s32.totalorder %s256_s1, %s150_s30  ;;  %s29_s27 = int_to_ptr.vmem [resolvable:$true] %s28_s27 }
  0x15   :  { %p154_p9 = scmp.lt.u32.totalorder %s150_s30, %s256_s1 }
  0x17   :  { %p156_p10 = pnand %p154_p9, %p151_p8 }
  0x19   :  { %159 = shalt.err (!%p156_p10)
}
  0x1a   :  { %s160_s8 = scalar_lea.vmem %s29_s27, 256  ;;  %p165_p12 = scmp.lt.s32.totalorder %s29_s27, %s29_s27 }
  0x1b   :  { %p161_p11 = scmp.ne.s32.totalorder %s29_s27, %s160_s8  ;;  %p166_p13 = scmp.lt.s32.totalorder %s160_s8, %s160_s8 }
  0x1d   :  { %p167_p0 = por %p166_p13, %p165_p12 }
  0x1f   :  { %p168_p1 = pnand %p167_p0, %p161_p11 }
  0x21   :  { %171 = shalt.err (!%p168_p1)
}
  0x22   :  { %34 = dma.hbm_to_vmem [thread:$0]  %s256_s1, 256, %s29_s27, [#allocation6], %s189_s22, %s189_s22, %s190_s23  }
  0x23   :  { %182 = dma.done.wait [#allocation3], 256  }
  0x24   :  { %183 = vsyncadd [#allocation3], 4294967040 }
  0x25   :  { %184 = dma.done.wait [#allocation6], 256  }
  0x26   :  { %185 = vsyncadd [#allocation6], 4294967040  ;;  %v54_v0 = vlaneseq  ;;  %v44_v4 = vld [vmem:[#allocation2] sm:$0xff]  ;;  %v45_v5 = vld [vmem:[#allocation2 + $0x8] sm:$0xff]  ;;  %vm84_vm0 = vcmask 1043456   ;;  %s172_s15 = scalar_lea.hbm %s258_s3, 16 }
  0x27   :  { %v46_v6 = vld [vmem:[#allocation5] sm:$0xff]  ;;  %v47_v7 = vld [vmem:[#allocation5 + $0x8] sm:$0xff]  ;;  %v48_v8 = vld [vmem:[%s257_s2] sm:$0x3]  ;;  %p173_p2 = scmp.ne.s32.totalorder %s258_s3, %s172_s15  ;;  %p176_p3 = scmp.lt.u32.totalorder %s172_s15, %s258_s3 }
  0x28   :  { %v55_v1 = vshrl.u32 %v54_v0, 7  ;;  %v49_v9 = vld [vmem:[%s257_s2 + $0x2] sm:$0x3]  ;;  %v50_v10 = vsub.f32 %v44_v4, %v46_v6  ;;  %v51_v14 = vsub.f32 %v45_v5, %v47_v7 }
  0x29   :  { %p178_p4 = pnand %p176_p3, %p173_p2 }
  0x2a   :  { %v56_v2 = vsub.s32 0, %v55_v1  ;;  %v60_v3 = vsub.s32 1, %v55_v1 }
  0x2c   :  { %v57_v11 = vrot.slane %v48_v8, %v56_v2  ;;  %v61_v12 = vrot.slane %v48_v8, %v60_v3  ;;  %v65_v13 = vrot.slane %v49_v9, %v56_v2  ;;  %v69_v15 = vrot.slane %v49_v9, %v60_v3 }
  0x2e   :  { %v70_v16 = vcombine.low %v57_v11, %v61_v12  ;;  %v71_v17 = vcombine.low %v65_v13, %v69_v15 }
  0x30   :  { %v74_v18 = vmul.f32 %v70_v16, %v50_v10  ;;  %v75_v19 = vmul.f32 %v71_v17, %v51_v14 }
  0x32   :  { %v76_v20 = vand.u32 2147483647, %v74_v18  ;;  %v77_v21 = vand.u32 2147483647, %v75_v19 }
  0x34   :  { %v80_v22 = vcombine.high %v76_v20, %v76_v20  ;;  %v85_v23 = vsel %vm84_vm0, %v76_v20, 0.0  ;;  %v81_v24 = vcombine.high %v77_v21, %v77_v21  ;;  %v88_v26 = vsel %vm84_vm0, %v77_v21, 0.0 }
  0x36   :  { %v86_v25 = vsel %vm84_vm0, %v80_v22, 0.0  ;;  %v90_v28 = vsel %vm84_vm0, %v81_v24, 0.0 }
  0x37   :  { %v87_v27 = vadd.f32 %v86_v25, %v85_v23 }
  0x39   :  { %v89_v29 = vadd.f32 %v88_v26, %v87_v27 }
  0x3b   :  { %v91_v30 = vadd.f32 %v90_v28, %v89_v29 }
  0x3d   :  { %92 = vadd.xlane.f32.xlu0 %v91_v30 }
  0xca   :  { %v93_v31 = vpop.xlane.xlu0 %92 }
  0xcb   :  { %v94_v32 = vrot.slane %v93_v31, 4 }
  0xcd   :  { %v95_v33 = vadd.f32 %v94_v32, %v93_v31 }
  0xcf   :  { %v96_v34 = vrot.slane %v95_v33, 2 }
  0xd1   :  { %v97_v35 = vadd.f32 %v96_v34, %v95_v33 }
  0xd3   :  { %v98_v36 = vrot.slane %v97_v35, 1 }
  0xd5   :  { %v99_v37 = vadd.f32 %v98_v36, %v97_v35 }
  0xd7   :  { %121 = vpush %v99_v37 }
 0x108   :  { %s122_s1 = spop %121 }
 0x109   :  { %102 = sst [smem:[#allocation7]] %s122_s1 }
 0x10a   :  { %181 = shalt.err (!%p178_p4)
}
 0x10b   :  { %s192_s20 = smov [#allocation7]  }
 0x10c   :  { %113 = dma.smem_to_hbm %s192_s20, 16, %s258_s3, [#allocation4]  }
 0x10d   :  { %186 = dma.done.wait [#allocation4], 16  }
 0x10e   :  { %187 = vsyncadd [#allocation4], 4294967280 }
 0x10f   :  { %117 = sfence }
 0x110   :  { %118 = vsyncpa [#allocation3], 1 }
 0x111   :  { %119 = vsyncpa [#allocation6], 1 }
 0x112   :  { %120 = vsyncpa [#allocation4], 1 }

</bundles_post_ra>
